<compile_context>
chip_gen: v6e
topology: v6e:2x2x1
jax: 0.10.0
libtpu: 0.0.40
codegen_flags: <defaults>
</compile_context>

<pallas_src>
import jax
import jax.numpy as jnp
from jax.experimental import pallas as pl
from jax.experimental.pallas import tpu as pltpu


def mlp_kernel(p_ref, x_ref, o_ref):
    # x_ref: (7, TB)  -> input features on sublanes, batch on lanes.
    # p_ref: (8, 128) -> packed, zero-padded parameters (see pack_params).
    # o_ref: (6, TB)  -> output features on sublanes, batch on lanes.
    x = x_ref[...]

    w1 = p_ref[:, 0:7]      # (8, 7) fc1 weight (out, in), rows 5..7 zero
    w2 = p_ref[:, 8:16]     # (8, 8) fc2 weight, zero-padded
    w3 = p_ref[:, 16:24]    # (8, 8) fc3 weight, zero-padded
    b1 = p_ref[:, 24:25]    # (8, 1) fc1 bias, zero-padded
    b2 = p_ref[:, 25:26]    # (8, 1) fc2 bias
    b3 = p_ref[:, 26:27]    # (8, 1) fc3 bias

    h1 = jnp.maximum(jnp.dot(w1, x, preferred_element_type=jnp.float32) + b1, 0.0)
    h2 = jnp.maximum(jnp.dot(w2, h1, preferred_element_type=jnp.float32) + b2, 0.0)
    z = jnp.dot(w3, h2, preferred_element_type=jnp.float32) + b3   # (8, TB)

    # Exact sigmoid: exp on the EUP slot, exact divide (kernel is HBM-bound,
    # so the exact reciprocal costs nothing in wall-clock but keeps full f32
    # accuracy). Only the 6 valid output rows are computed/stored.
    zs = z[0:6, :]
    o_ref[...] = 1.0 / (1.0 + jnp.exp(-zs))


def _choose_tb(b128, num_cores=2):
    """Batch tile (lane) width: multiple of 128, clamped to [512, 8192], aiming
    for >= 4 pipelined grid steps per TensorCore (v7x has 2 TCs), but never
    larger than the 128-padded batch so padding doesn't inflate HBM traffic."""
    target_steps = max(4 * num_cores, 1)
    tb = b128 // target_steps
    tb = max(512, min(tb, 8192))
    tb = min(tb, b128)
    tb = max(128, 128 * (tb // 128))
    return tb


@jax.jit
def net_forward(x, packed):
    """x: (B, 7) float32 (batch-major, PyTorch layout). Returns (B, 6) float32."""
    x = x.astype(jnp.float32)
    B = x.shape[0]

    b128 = 128 * pl.cdiv(B, 128)
    tb = _choose_tb(b128)
    b_pad = tb * pl.cdiv(b128, tb)

    # Feature-major staging: (7, B_pad); one fused pad-of-transpose (no
    # zeros + scatter). Columns B: are zero padding.
    xt = jnp.pad(x.T, ((0, 0), (0, b_pad - B)))

    out = pl.pallas_call(
        mlp_kernel,
        out_shape=jax.ShapeDtypeStruct((6, b_pad), jnp.float32),
        grid=(b_pad // tb,),
        in_specs=[
            pl.BlockSpec((8, 128), lambda i: (0, 0)),   # packed params: resident
            pl.BlockSpec((7, tb), lambda i: (0, i)),    # batch tile (double-buffered)
        ],
        out_specs=pl.BlockSpec((6, tb), lambda i: (0, i)),
        compiler_params=pltpu.CompilerParams(
            dimension_semantics=("parallel",),
        ),
    )(packed, xt)

    # Drop padded batch columns, back to (B, 6).
    return out[:, 0:B].T


def init_params(key):
    """PyTorch nn.Linear default init: U(-1/sqrt(fan_in), 1/sqrt(fan_in)),
    weights stored in PyTorch (out_features, in_features) layout."""
    dims = [(5, 7), (3, 5), (6, 3)]  # (out, in) for fc1, fc2, fc3
    params = {}
    keys = jax.random.split(key, 2 * len(dims))
    for idx, (fan_out, fan_in) in enumerate(dims):
        bound = 1.0 / jnp.sqrt(fan_in)
        wk, bk = keys[2 * idx], keys[2 * idx + 1]
        params[f"w{idx + 1}"] = jax.random.uniform(
            wk, (fan_out, fan_in), jnp.float32, minval=-bound, maxval=bound)
        params[f"b{idx + 1}"] = jax.random.uniform(
            bk, (fan_out,), jnp.float32, minval=-bound, maxval=bound)
    return params


def pack_params(params):
    """Pack all weights/biases (82 floats) into a single zero-padded (8, 128) tile.
    Layout: cols 0:8 / 8:16 / 16:24 = fc1/fc2/fc3 weights (zero-padded),
            cols 24 / 25 / 26       = fc1/fc2/fc3 biases (length-8, zero-padded)."""
    p = jnp.zeros((8, 128), jnp.float32)
    dims = [(5, 7), (3, 5), (6, 3)]
    for l, (out_f, in_f) in enumerate(dims):
        p = p.at[0:out_f, 8 * l:8 * l + in_f].set(params[f"w{l + 1}"])
        p = p.at[0:out_f, 24 + l].set(params[f"b{l + 1}"])
    return p


if __name__ == "__main__":
    key = jax.random.PRNGKey(0)
    pkey, xkey = jax.random.split(key)
    params = init_params(pkey)
    packed = pack_params(params)

    B = 256  # small demo batch; lane-dense (adaptive tb picks one 256-lane tile)
    x = jax.random.normal(xkey, (B, 7), dtype=jnp.float32)

    out = net_forward(x, packed)
    out = jax.block_until_ready(out)

    assert out.shape == (B, 6), out.shape

    # Cross-check against a plain-JAX reference (PyTorch conventions), with
    # HIGHEST matmul precision so the reference itself is f32-accurate.
    def ref(x, p):
        hi = jax.lax.Precision.HIGHEST
        h = jnp.maximum(jnp.dot(x, p["w1"].T, precision=hi) + p["b1"], 0.0)
        h = jnp.maximum(jnp.dot(h, p["w2"].T, precision=hi) + p["b2"], 0.0)
        return jax.nn.sigmoid(jnp.dot(h, p["w3"].T, precision=hi) + p["b3"])

    expected = ref(x, params)
    assert bool(jnp.allclose(out, expected, atol=1e-3, rtol=1e-3)), \
        float(jnp.max(jnp.abs(out - expected)))

    print("KERNEL_OK")
</pallas_src>

<mosaic_0001>
module attributes {stable_mosaic.version = 11 : i64} {
  func.func @mlp_kernel(%arg0: i32, %arg1: memref<8x128xf32, #tpu.memory_space<vmem>>, %arg2: memref<7x256xf32, #tpu.memory_space<vmem>>, %arg3: memref<6x256xf32, #tpu.memory_space<vmem>>) attributes {dimension_semantics = [#tpu.dimension_semantics<parallel>], iteration_bounds = array<i64: 1>, scalar_prefetch = 0 : i64, scratch_operands = 0 : i64, tpu.core_type = #tpu.core_type<tc>, window_params = [{pipeline_mode = #tpu.pipeline_mode<synchronous>, transform_indices = @transform_0, window_bounds = array<i64: 8, 128>}, {transform_indices = @transform_1, window_bounds = array<i64: 7, 256>}, {transform_indices = @transform_2, window_bounds = array<i64: 6, 256>}]} {
    %c0 = arith.constant 0 : index
    %c0_0 = arith.constant 0 : index
    %0 = vector.load %arg2[%c0, %c0_0] : memref<7x256xf32, #tpu.memory_space<vmem>>, vector<7x256xf32>
    %c0_1 = arith.constant 0 : index
    %c0_2 = arith.constant 0 : index
    %1 = vector.load %arg1[%c0_1, %c0_2] : memref<8x128xf32, #tpu.memory_space<vmem>>, vector<8x7xf32>
    %c0_3 = arith.constant 0 : index
    %c8 = arith.constant 8 : index
    %2 = vector.load %arg1[%c0_3, %c8] : memref<8x128xf32, #tpu.memory_space<vmem>>, vector<8x8xf32>
    %c0_4 = arith.constant 0 : index
    %c16 = arith.constant 16 : index
    %3 = vector.load %arg1[%c0_4, %c16] : memref<8x128xf32, #tpu.memory_space<vmem>>, vector<8x8xf32>
    %c0_5 = arith.constant 0 : index
    %c24 = arith.constant 24 : index
    %4 = vector.load %arg1[%c0_5, %c24] : memref<8x128xf32, #tpu.memory_space<vmem>>, vector<8x1xf32>
    %c0_6 = arith.constant 0 : index
    %c25 = arith.constant 25 : index
    %5 = vector.load %arg1[%c0_6, %c25] : memref<8x128xf32, #tpu.memory_space<vmem>>, vector<8x1xf32>
    %c0_7 = arith.constant 0 : index
    %c26 = arith.constant 26 : index
    %6 = vector.load %arg1[%c0_7, %c26] : memref<8x128xf32, #tpu.memory_space<vmem>>, vector<8x1xf32>
    %cst = arith.constant dense<0.000000e+00> : vector<8x256xf32>
    %7 = tpu.matmul %1, %0, %cst {dimension_numbers = #tpu.dot_dimension_numbers<[1], [0], [0], [1], [0, 0, 1, 1], [], []>} : vector<8x7xf32>, vector<7x256xf32>, vector<8x256xf32> -> vector<8x256xf32>
    %8 = vector.broadcast %4 : vector<8x1xf32> to vector<8x256xf32>
    %9 = arith.addf %7, %8 : vector<8x256xf32>
    %cst_8 = arith.constant 0.000000e+00 : f32
    %10 = vector.broadcast %cst_8 : f32 to vector<8x256xf32>
    %11 = arith.maximumf %9, %10 : vector<8x256xf32>
    %cst_9 = arith.constant dense<0.000000e+00> : vector<8x256xf32>
    %12 = tpu.matmul %2, %11, %cst_9 {dimension_numbers = #tpu.dot_dimension_numbers<[1], [0], [0], [1], [0, 0, 1, 1], [], []>} : vector<8x8xf32>, vector<8x256xf32>, vector<8x256xf32> -> vector<8x256xf32>
    %13 = vector.broadcast %5 : vector<8x1xf32> to vector<8x256xf32>
    %14 = arith.addf %12, %13 : vector<8x256xf32>
    %cst_10 = arith.constant 0.000000e+00 : f32
    %15 = vector.broadcast %cst_10 : f32 to vector<8x256xf32>
    %16 = arith.maximumf %14, %15 : vector<8x256xf32>
    %cst_11 = arith.constant dense<0.000000e+00> : vector<8x256xf32>
    %17 = tpu.matmul %3, %16, %cst_11 {dimension_numbers = #tpu.dot_dimension_numbers<[1], [0], [0], [1], [0, 0, 1, 1], [], []>} : vector<8x8xf32>, vector<8x256xf32>, vector<8x256xf32> -> vector<8x256xf32>
    %18 = vector.broadcast %6 : vector<8x1xf32> to vector<8x256xf32>
    %19 = arith.addf %17, %18 : vector<8x256xf32>
    %20 = vector.extract_strided_slice %19 {offsets = [0, 0], sizes = [6, 256], strides = [1, 1]} : vector<8x256xf32> to vector<6x256xf32>
    %cst_12 = arith.constant 0.000000e+00 : f32
    %21 = vector.broadcast %cst_12 : f32 to vector<6x256xf32>
    %22 = arith.subf %21, %20 : vector<6x256xf32>
    %23 = math.exp %22 : vector<6x256xf32>
    %cst_13 = arith.constant 1.000000e+00 : f32
    %24 = vector.broadcast %cst_13 : f32 to vector<6x256xf32>
    %25 = arith.addf %24, %23 : vector<6x256xf32>
    %cst_14 = arith.constant 1.000000e+00 : f32
    %26 = vector.broadcast %cst_14 : f32 to vector<6x256xf32>
    %27 = arith.divf %26, %25 : vector<6x256xf32>
    %c0_15 = arith.constant 0 : index
    %c0_16 = arith.constant 0 : index
    %28 = vector.load %arg3[%c0_15, %c0_16] : memref<6x256xf32, #tpu.memory_space<vmem>>, vector<6x256xf32>
    tpu.vector_store %arg3[%c0_15, %c0_16], %27 {strides = array<i32>} : memref<6x256xf32, #tpu.memory_space<vmem>>, vector<6x256xf32>,
    return
  }
  func.func @transform_0(%arg0: i32) -> (i32, i32) {
    %c0_i32 = arith.constant 0 : i32
    %c0_i32_0 = arith.constant 0 : i32
    %c0_i32_1 = arith.constant 0 : i32
    return %c0_i32, %c0_i32_0 : i32, i32
  }
  func.func @transform_1(%arg0: i32) -> (i32, i32) {
    %c0_i32 = arith.constant 0 : i32
    %c0_i32_0 = arith.constant 0 : i32
    return %c0_i32, %arg0 : i32, i32
  }
  func.func @transform_2(%arg0: i32) -> (i32, i32) {
    %c0_i32 = arith.constant 0 : i32
    %c0_i32_0 = arith.constant 0 : i32
    return %c0_i32, %arg0 : i32, i32
  }
}

</mosaic_0001>

<bundles_post_ra>
// kernel: net_forward.1
= control target key start
LH: loop header
LB: loop body
LE: loop exit
PB: predicated region body
PF: predicated region fallthrough
CT: control target
= control target key end

     0   :  { %7 = vsyncpa [#allocation3], 0  ;;  %s444_s0 = inlined_call_operand.hbm [shape: f32[8,128], index: 0, kind: input, shape index: {}]   ;;  %s445_s1 = inlined_call_operand.hbm [shape: f32[7,256], index: 1, kind: input, shape index: {}]   ;;  %s446_s2 = inlined_call_operand.hbm [shape: f32[6,256], index: 2, kind: output, shape index: {}]  }
   0x1   :  { %8 = vsyncpa [#allocation6], 0 }
   0x2   :  { %9 = vsyncpa [#allocation4], 0  ;;  %s409_s9 = smov [#allocation2]   ;;  %s410_s11 = smov [#allocation5]  }
   0x3   :  { %s16_s10 = sshll.u32 %s409_s9, 4  ;;  %s26_s12 = sshll.u32 %s410_s11, 4  ;;  %s17_s10 = int_to_ptr.vmem [resolvable:$true] %s16_s10  ;;  %s27_s12 = int_to_ptr.vmem [resolvable:$true] %s26_s12 }
   0x4   :  { %s351_s13 = scalar_lea.vmem %s17_s10, 128  ;;  %p356_p1 = scmp.lt.s32.totalorder %s17_s10, %s17_s10 }
   0x5   :  { %p352_p0 = scmp.ne.s32.totalorder %s17_s10, %s351_s13  ;;  %p357_p2 = scmp.lt.s32.totalorder %s351_s13, %s351_s13 }
   0x7   :  { %p358_p3 = por %p357_p2, %p356_p1 }
   0x9   :  { %p359_p4 = pnand %p358_p3, %p352_p0 }
   0xb   :  { %362 = shalt.err (!%p359_p4)
}
   0xc   :  { %19 = dma.hbm_to_vmem [thread:$0]  %s444_s0, 128, %s17_s10, [#allocation3]  }
   0xd   :  { %s371_s16 = scalar_lea.vmem %s27_s12, 256  ;;  %p376_p6 = scmp.lt.s32.totalorder %s27_s12, %s27_s12 }
   0xe   :  { %p372_p5 = scmp.ne.s32.totalorder %s27_s12, %s371_s16  ;;  %p377_p7 = scmp.lt.s32.totalorder %s371_s16, %s371_s16 }
  0x10   :  { %p378_p8 = por %p377_p7, %p376_p6 }
  0x12   :  { %p379_p9 = pnand %p378_p8, %p372_p5 }
  0x14   :  { %382 = shalt.err (!%p379_p9)
}
  0x15   :  { %29 = dma.hbm_to_vmem [thread:$0]  %s445_s1, 256, %s27_s12, [#allocation6]  }
  0x16   :  { %403 = dma.done.wait [#allocation3], 128  }
  0x17   :  { %404 = vsyncadd [#allocation3], 4294967168 }
  0x18   :  { %405 = dma.done.wait [#allocation6], 256  }
  0x19   :  { %406 = vsyncadd [#allocation6], 4294967040  ;;  %v411_v0 = vmov 0.0   ;;  %v412_v1 = vmov 24   ;;  %vm47_vm0 = vcmask 1046528   ;;  %v38_v4 = vld [vmem:[#allocation2] sm:$0xff] }
  0x1a   :  { %118 = vmatprep.mubr.f32.mxu0 %v411_v0  ;;  %332 = vset.pattern.permute.xlu0 %v412_v1  ;;  %v37_v2 = vld [vmem:[#allocation5 + $0x8] sm:$0x7f]  ;;  %v36_v3 = vld [vmem:[#allocation5] sm:$0x7f]  ;;  %vm44_vm1 = vcmask 56320   ;;  %s413_s0 = smov 120  }
  0x1b   :  { %200 = vmatprep.mubr.f32.mxu1 %v411_v0  ;;  %318 = vmatprep.subr.msk.mxu0 %vm47_vm0, %v37_v2  ;;  %v414_v5 = vmov 25   ;;  %s415_s1 = smov 112   ;;  %vm133_vm2 = vcmask 64512   ;;  %v416_v14 = vmov 26   ;;  %s417_s19 = smov [#allocation7]  }
  0x1c   :  { %41 = vperm.xlu0 %332, %v38_v4   ;;  %319 = vmatpush1.msk.msra.mxu0 %vm47_vm0, %v36_v3  ;;  %s308_s20 = sshll.u32 %s417_s19, 4  ;;  %s309_s20 = int_to_ptr.vmem [resolvable:$true] %s308_s20 }
  0x1d   :  { %320 = vmatmul.mubr.msk.f32.vlgmr.msra.gmra.mxu0 %vm44_vm1, %v38_v4  ;;  %333 = vset.pattern.permute.xlu1 %v414_v5  ;;  %s383_s21 = scalar_lea.vmem %s309_s20, 256  ;;  %p388_p11 = scmp.lt.s32.totalorder %s309_s20, %s309_s20 }
  0x1e   :  { %281 = vmatprep.mubr.f32.mxu0 %v411_v0  ;;  %128 = vperm.xlu1 %333, %v38_v4   ;;  %p384_p10 = scmp.ne.s32.totalorder %s309_s20, %s383_s21  ;;  %p389_p12 = scmp.lt.s32.totalorder %s383_s21, %s383_s21 }
  0x20   :  { %131 = vrot.lane.b32.xlu0 %v38_v4, %s413_s0  ;;  %p390_p13 = por %p389_p12, %p388_p11 }
  0x21   :  { %334 = vset.pattern.permute.xlu0 %v416_v14 }
  0x22   :  { %213 = vrot.lane.b32.xlu1 %v38_v4, %s415_s1  ;;  %p391_p0 = pnand %p390_p13, %p384_p10 }
  0x24   :  { %210 = vperm.xlu0 %334, %v38_v4  }
  0x97   :  { %v42_v6 = vpop.permute.xlu0 %41 }
  0x99   :  { %v129_v15 = vpop.permute.xlu1 %128 }
  0x9b   :  { %v132_v13 = vpop.permute.xlu0 %131 }
  0x9d   :  { %v214_v22 = vpop.permute.xlu1 %213 }
  0x9f   :  { %v211_v23 = vpop.permute.xlu0 %210 }
  0xdd   :  { %v120_v7 = vpop.f32.mrf.mxu0 }
  0xde   :  { %v121_v8 = vadd.f32 %v120_v7, %v42_v6 }
  0xdf   :  { %v122_v9 = vpop.f32.mrf.mxu0 }
  0xe0   :  { %v123_v10 = vadd.f32 %v122_v9, %v42_v6  ;;  %v125_v12 = vmax.f32 %v121_v8, 0.0 }
  0xe2   :  { %v126_v11 = vmax.f32 %v123_v10, 0.0 }
  0xe4   :  { %166 = vmatprep.subr.mxu1 %v126_v11 }
  0xe5   :  { %167 = vmatpush1.msra.mxu1 %v125_v12 }
  0xe6   :  { %321 = vmatmul.mubr.msk.f32.vlgmr.msra.gmra.mxu1 %vm133_vm2, %v132_v13 }
 0x1a6   :  { %v202_v16 = vpop.f32.mrf.mxu1 }
 0x1a7   :  { %v203_v17 = vadd.f32 %v202_v16, %v129_v15 }
 0x1a8   :  { %v204_v18 = vpop.f32.mrf.mxu1 }
 0x1a9   :  { %v205_v19 = vadd.f32 %v204_v18, %v129_v15  ;;  %v207_v21 = vmax.f32 %v203_v17, 0.0 }
 0x1ab   :  { %v208_v20 = vmax.f32 %v205_v19, 0.0 }
 0x1ad   :  { %247 = vmatprep.subr.mxu0 %v208_v20 }
 0x1ae   :  { %248 = vmatpush1.msra.mxu0 %v207_v21 }
 0x1af   :  { %322 = vmatmul.mubr.msk.f32.vlgmr.msra.gmra.mxu0 %vm133_vm2, %v214_v22 }
 0x26f   :  { %v283_v24 = vpop.f32.mrf.mxu0 }
 0x270   :  { %v284_v25 = vadd.f32 %v283_v24, %v211_v23 }
 0x271   :  { %v285_v26 = vpop.f32.mrf.mxu0 }
 0x272   :  { %v288_v27 = vsub.f32 0.0, %v284_v25  ;;  %v286_v28 = vadd.f32 %v285_v26, %v211_v23 }
 0x274   :  { %v290_v29 = vmul.f32 1.442695, %v288_v27  ;;  %v289_v30 = vsub.f32 0.0, %v286_v28 }
 0x276   :  { %335 = vpow2.f32 %v290_v29  ;;  %v292_v31 = vmul.f32 1.442695, %v289_v30 }
 0x278   :  { %337 = vpow2.f32 %v292_v31 }
 0x283   :  { %v336_v32 = vpop.eup %335 }
 0x284   :  { %v294_v33 = vadd.f32 1.0, %v336_v32 }
 0x285   :  { %v338_v34 = vpop.eup %337 }
 0x286   :  { %339 = vrcp.f32 %v294_v33  ;;  %v295_v35 = vadd.f32 1.0, %v338_v34 }
 0x288   :  { %341 = vrcp.f32 %v295_v35 }
 0x293   :  { %v340_v36 = vpop.eup %339 }
 0x294   :  { %300 = vst [vmem:[#allocation7] sm:$0x3f] %v340_v36 }
 0x295   :  { %v342_v37 = vpop.eup %341 }
 0x296   :  { %301 = vst [vmem:[#allocation7 + $0x8] sm:$0x3f] %v342_v37 }
 0x297   :  { %394 = shalt.err (!%p391_p0)
}
 0x298   :  { %311 = dma.vmem_to_hbm [thread:$0]  %s309_s20, 256, %s446_s2, [#allocation4]  }
 0x299   :  { %407 = dma.done.wait [#allocation4], 256  }
 0x29a   :  { %408 = vsyncadd [#allocation4], 4294967040 }
 0x29b   :  { %315 = vsyncpa [#allocation3], 1 }
 0x29c   :  { %316 = vsyncpa [#allocation6], 1 }
 0x29d   :  { %317 = vsyncpa [#allocation4], 1 }

</bundles_post_ra>
